<compile_context>
chip_gen: v7x
topology: tpu7x:2x2x1
jax: 0.10.0
libtpu: 0.0.40
codegen_flags: <defaults>
</compile_context>

<pallas_src>
import functools

import jax
import jax.numpy as jnp
from jax.experimental import pallas as pl
from jax.experimental.pallas import tpu as pltpu

LANE = 128


def _round_up(x, m):
    return ((x + m - 1) // m) * m


def _elu(x):
    # ELU; clamp the negative-branch argument so the discarded lanes never overflow.
    return jnp.where(x > 0, x, jnp.exp(jnp.minimum(x, 0.0)) - 1.0)


def _fused_ac_kernel(obs_ref, h_ref, wmlp_ref, wgru_ref, b_ref, out_ref):
    """One grid step = one network (encoder -> GRU core -> decoder -> head) on one
    batch tile.

    grid=(N, n_batch_tiles): net 0 = actor, net 1 = critic (N==1: critic only for
    values_only).  The weight BlockSpecs' index_map is constant along the inner
    batch axis, so the bf16 weight slabs are DMA'd once per net and stay
    VMEM-resident across batch tiles.

    Packed per-net layouts (leading net dim squeezed away by the BlockSpec):
      wmlp_ref : (Dp+3*Hp, Hp) bf16, rows = [we1 | we2 | wd | wo]
      wgru_ref : (2*Hp, 3*Hp)  bf16, rows = [enc-side ; h-side], cols = [r | z | n]
      b_ref    : (8, Hp) f32,  rows = [be1, be2, b_r, b_z, b_in, b_hn, bd, bo]
    Everything is pre-padded to 128 lanes, so all matmuls/stores are lane-dense.
    """
    Dp = obs_ref.shape[-1]          # padded obs dim
    Hp = h_ref.shape[-1]            # padded hidden / head dim
    bf16 = jnp.bfloat16

    x = obs_ref[...]                # (TB, Dp) f32 shared observations
    h = h_ref[...]                  # (TB, Hp) f32 this net's rnn state
    b = b_ref[...]                  # (8, Hp)  f32 packed biases

    def mm(a, w_bf16):
        # bf16 MXU matmul, f32 accumulate.
        return jnp.dot(a.astype(bf16), w_bf16, preferred_element_type=jnp.float32)

    # ---- encoder: 2-layer MLP with ELU (elementwise math in f32) ----
    h1 = _elu(mm(x, wmlp_ref[0:Dp, :]) + b[0:1, :])
    enc = _elu(mm(h1, wmlp_ref[Dp:Dp + Hp, :]) + b[1:2, :])

    # ---- core: GRU cell.  Two dots (enc-side, h-side): no activation concat, no
    # structurally-zero weight quadrants.  torch GRUCell gate semantics kept:
    #   n = tanh(i_n + b_in + r * (h_n + b_hn))   (r/z biases pre-summed at pack time)
    gi = mm(enc, wgru_ref[0:Hp, :])        # (TB, 3*Hp)
    gh = mm(h, wgru_ref[Hp:2 * Hp, :])     # (TB, 3*Hp)
    r = jax.nn.sigmoid(gi[:, 0:Hp] + gh[:, 0:Hp] + b[2:3, :])
    z = jax.nn.sigmoid(gi[:, Hp:2 * Hp] + gh[:, Hp:2 * Hp] + b[3:4, :])
    n = jnp.tanh(gi[:, 2 * Hp:3 * Hp] + b[4:5, :] +
                 r * (gh[:, 2 * Hp:3 * Hp] + b[5:6, :]))
    new_h = (1.0 - z) * n + z * h

    # ---- decoder (1-layer MLP, ELU) + linear output head ----
    d = _elu(mm(new_h, wmlp_ref[Dp + Hp:Dp + 2 * Hp, :]) + b[6:7, :])
    out = mm(d, wmlp_ref[Dp + 2 * Hp:Dp + 3 * Hp, :]) + b[7:8, :]

    # Two 128-lane-aligned full-lane stores (no materialized concat buffer):
    # output slab = [head_out (Hp) | new_h (Hp)].
    out_ref[:, 0:Hp] = out
    out_ref[:, Hp:2 * Hp] = new_h


def _run_fused(obs_p, h_s, w_mlp_s, w_gru_s, bias_s, *, tb):
    """Run N independent networks (actor/critic) x batch tiles in one pallas_call."""
    N, B_pad, Hp = h_s.shape
    Dp = obs_p.shape[1]
    nbt = B_pad // tb

    # Advisory cost hint so XLA overlaps the sampling/log_softmax epilogue.
    flops = 2 * N * B_pad * (Dp * Hp + 9 * Hp * Hp)
    transcendentals = 6 * N * B_pad * Hp
    bytes_accessed = (w_mlp_s.size * 2 + w_gru_s.size * 2 + bias_s.size * 4 +
                      N * obs_p.size * 4 + h_s.size * 4 + N * B_pad * 2 * Hp * 4)

    return pl.pallas_call(
        _fused_ac_kernel,
        out_shape=jax.ShapeDtypeStruct((N, B_pad, 2 * Hp), jnp.float32),
        grid=(N, nbt),
        in_specs=[
            pl.BlockSpec((tb, Dp), lambda i, bt: (bt, 0)),                    # shared obs
            pl.BlockSpec((None, tb, Hp), lambda i, bt: (i, bt, 0)),           # rnn states
            pl.BlockSpec((None, Dp + 3 * Hp, Hp), lambda i, bt: (i, 0, 0)),   # MLP slab (bf16)
            pl.BlockSpec((None, 2 * Hp, 3 * Hp), lambda i, bt: (i, 0, 0)),    # GRU slab (bf16)
            pl.BlockSpec((None, 8, Hp), lambda i, bt: (i, 0, 0)),             # biases (f32)
        ],
        out_specs=pl.BlockSpec((None, tb, 2 * Hp), lambda i, bt: (i, bt, 0)),
        compiler_params=pltpu.CompilerParams(
            # nets are independent -> "parallel"; batch tiles innermost "arbitrary"
            # so the constant-index weight slabs are not re-fetched per tile.
            dimension_semantics=("parallel", "arbitrary"),
        ),
        cost_estimate=pl.CostEstimate(flops=flops,
                                      transcendentals=transcendentals,
                                      bytes_accessed=bytes_accessed),
    )(obs_p, h_s, w_mlp_s, w_gru_s, bias_s)


def init_net_params(key, obs_dim, hidden, out_dim, bias_scale=0.0):
    """Logical (unpadded) parameters: orthogonal weights, zero biases, mirroring
    ActorCritic.initialize_weights(policy_initialization='orthogonal').
    bias_scale>0 lets the demo exercise the packed-bias path with non-trivial values."""
    ks = jax.random.split(key, 12)
    ortho = jax.nn.initializers.orthogonal()

    def bias(k, n):
        if bias_scale == 0.0:
            return jnp.zeros((1, n), jnp.float32)
        return bias_scale * jax.random.normal(k, (1, n), jnp.float32)

    return {
        # encoder
        "we1": ortho(ks[0], (obs_dim, hidden), jnp.float32), "be1": bias(ks[6], hidden),
        "we2": ortho(ks[1], (hidden, hidden), jnp.float32), "be2": bias(ks[7], hidden),
        # GRU core (weights stored [in, 3H], torch gate order r|z|n)
        "wih": ortho(ks[2], (hidden, 3 * hidden), jnp.float32), "bih": bias(ks[8], 3 * hidden),
        "whh": ortho(ks[3], (hidden, 3 * hidden), jnp.float32), "bhh": bias(ks[9], 3 * hidden),
        # decoder
        "wd": ortho(ks[4], (hidden, hidden), jnp.float32), "bd": bias(ks[10], hidden),
        # output head
        "wo": ortho(ks[5], (hidden, out_dim), jnp.float32), "bo": bias(ks[11], out_dim),
    }


def pack_net_params(p, obs_dim, hidden, out_dim):
    """Pack one network's 14 parameters into 3 lane-padded slabs.

    w_mlp (bf16): rows = [we1 | we2 | wd | wo], columns padded to Hp lanes.
    w_gru (bf16): rows [0:Hp] = input(enc) side, rows [Hp:2Hp] = hidden side,
                  128-lane-aligned column blocks = [r | z | n].
    bias  (f32) : rows = [be1, be2, b_r, b_z, b_in, b_hn, bd, bo]; r/z biases are
                  pre-summed, n-gate biases stay split (torch tanh(i_n+b_in+r*(h_n+b_hn))).
    """
    Dp = _round_up(obs_dim, LANE)
    Hp = _round_up(hidden, LANE)
    assert out_dim <= Hp, "head out_dim must fit in one padded hidden slab"
    H = hidden

    def pad2(w, rows, cols):
        return jnp.pad(w, ((0, rows - w.shape[0]), (0, cols - w.shape[1])))

    w_mlp = jnp.concatenate([
        pad2(p["we1"], Dp, Hp), pad2(p["we2"], Hp, Hp),
        pad2(p["wd"], Hp, Hp), pad2(p["wo"], Hp, Hp)], axis=0)      # (Dp+3Hp, Hp)
    w_mlp = w_mlp.astype(jnp.bfloat16)

    wih, whh = p["wih"], p["whh"]
    w_gru = jnp.zeros((2 * Hp, 3 * Hp), jnp.float32)
    w_gru = w_gru.at[0:H, 0 * Hp:0 * Hp + H].set(wih[:, 0:H])               # W_ir
    w_gru = w_gru.at[0:H, 1 * Hp:1 * Hp + H].set(wih[:, H:2 * H])           # W_iz
    w_gru = w_gru.at[0:H, 2 * Hp:2 * Hp + H].set(wih[:, 2 * H:3 * H])       # W_in
    w_gru = w_gru.at[Hp:Hp + H, 0 * Hp:0 * Hp + H].set(whh[:, 0:H])         # W_hr
    w_gru = w_gru.at[Hp:Hp + H, 1 * Hp:1 * Hp + H].set(whh[:, H:2 * H])     # W_hz
    w_gru = w_gru.at[Hp:Hp + H, 2 * Hp:2 * Hp + H].set(whh[:, 2 * H:3 * H])  # W_hn
    w_gru = w_gru.astype(jnp.bfloat16)

    bih, bhh = p["bih"], p["bhh"]
    bias = jnp.zeros((8, Hp), jnp.float32)
    bias = bias.at[0, :H].set(p["be1"][0])
    bias = bias.at[1, :H].set(p["be2"][0])
    bias = bias.at[2, :H].set(bih[0, 0:H] + bhh[0, 0:H])
    bias = bias.at[3, :H].set(bih[0, H:2 * H] + bhh[0, H:2 * H])
    bias = bias.at[4, :H].set(bih[0, 2 * H:3 * H])
    bias = bias.at[5, :H].set(bhh[0, 2 * H:3 * H])
    bias = bias.at[6, :H].set(p["bd"][0])
    bias = bias.at[7, :out_dim].set(p["bo"][0])
    return w_mlp, w_gru, bias


def pack_actor_critic(actor_params, critic_params, obs_dim, hidden, num_actions):
    """Stack the actor / critic packed slabs on a leading axis (net 0 = actor)."""
    a = pack_net_params(actor_params, obs_dim, hidden, num_actions)
    c = pack_net_params(critic_params, obs_dim, hidden, 1)
    return {
        "w_mlp": jnp.stack([a[0], c[0]]),   # (2, Dp+3Hp, Hp)  bf16
        "w_gru": jnp.stack([a[1], c[1]]),   # (2, 2Hp, 3Hp)    bf16
        "bias": jnp.stack([a[2], c[2]]),    # (2, 8, Hp)       f32
    }


@functools.partial(jax.jit, static_argnames=("num_actions", "values_only"))
def actor_critic_forward(obs, rnn_states, packed, sample_key, num_actions,
                         values_only=False):
    """ActorCriticSeparateWeights.forward semantics (sample_actions=True)."""
    B = obs.shape[0]
    hidden = rnn_states.shape[1] // 2
    Hp = packed["w_mlp"].shape[-1]
    Dp = packed["w_mlp"].shape[-2] - 3 * Hp

    # rnn_states.chunk(2, dim=1) -> (actor_rnn, critic_rnn)
    actor_rnn, critic_rnn = jnp.split(rnn_states, 2, axis=1)

    # Batch tiling: small batches run as one tile; large batches use 256-row MXU
    # tiles with the weight slabs resident across tiles.
    if B <= 256:
        b_pad = _round_up(B, 8)
        tb = b_pad
    else:
        b_pad = _round_up(B, 256)
        tb = 256

    def pad_to(x, rows, cols):
        return jnp.pad(x.astype(jnp.float32),
                       ((0, rows - x.shape[0]), (0, cols - x.shape[1])))

    obs_p = pad_to(obs, b_pad, Dp)

    if values_only:
        # only the critic network runs, matching the torch module's values_only path
        h_s = pad_to(critic_rnn, b_pad, Hp)[None]
        w_mlp, w_gru, bias = (packed["w_mlp"][1:2], packed["w_gru"][1:2],
                              packed["bias"][1:2])
    else:
        h_s = jnp.stack([pad_to(actor_rnn, b_pad, Hp),
                         pad_to(critic_rnn, b_pad, Hp)])
        w_mlp, w_gru, bias = packed["w_mlp"], packed["w_gru"], packed["bias"]

    out = _run_fused(obs_p, h_s, w_mlp, w_gru, bias, tb=tb)   # (N, b_pad, 2*Hp)

    critic_idx = out.shape[0] - 1
    # torch: values = critic.tail(...).squeeze(); index the last dim explicitly so a
    # B == 1 batch dimension is never squeezed away.
    values = out[critic_idx, :B, 0]
    new_h_critic = out[critic_idx, :B, Hp:Hp + hidden]
    result = {"values": values}

    if values_only:
        result["new_rnn_states"] = new_h_critic
        return result

    action_logits = out[0, :B, :num_actions]
    new_h_actor = out[0, :B, Hp:Hp + hidden]
    result["action_logits"] = action_logits
    # _maybe_sample_actions(sample_actions=True)
    # TODO(synk): torch.distributions.Categorical uses torch's RNG stream; reproduced
    # with jax.random.categorical (same distribution, different stream).
    actions = jax.random.categorical(sample_key, action_logits, axis=-1)
    log_probs = jax.nn.log_softmax(action_logits, axis=-1)
    result["actions"] = actions
    result["log_prob_actions"] = jnp.take_along_axis(
        log_probs, actions[:, None], axis=-1)[:, 0]
    result["new_rnn_states"] = jnp.concatenate([new_h_actor, new_h_critic], axis=1)
    return result


def _ref_net(obs, h, p, weight_dtype=jnp.float32):
    """Pure-JAX reference of one network (torch GRUCell semantics), unpadded.
    weight_dtype=bf16 mirrors the kernel's bf16-weight / f32-accumulate matmuls."""
    def mm(a, w):
        return jnp.dot(a.astype(weight_dtype), w.astype(weight_dtype),
                       preferred_element_type=jnp.float32)

    def elu(x):
        return jnp.where(x > 0, x, jnp.exp(jnp.minimum(x, 0.0)) - 1.0)

    h1 = elu(mm(obs, p["we1"]) + p["be1"])
    enc = elu(mm(h1, p["we2"]) + p["be2"])
    H = h.shape[1]
    gi = mm(enc, p["wih"]) + p["bih"]
    gh = mm(h, p["whh"]) + p["bhh"]
    r = jax.nn.sigmoid(gi[:, :H] + gh[:, :H])
    z = jax.nn.sigmoid(gi[:, H:2 * H] + gh[:, H:2 * H])
    n = jnp.tanh(gi[:, 2 * H:] + r * gh[:, 2 * H:])
    new_h = (1 - z) * n + z * h
    d = elu(mm(new_h, p["wd"]) + p["bd"])
    return mm(d, p["wo"]) + p["bo"], new_h


if __name__ == "__main__":
    B, OBS_DIM, HIDDEN, NUM_ACTIONS = 8, 24, 32, 6

    key = jax.random.PRNGKey(0)
    k_obs, k_rnn, k_actor, k_critic, k_sample = jax.random.split(key, 5)

    obs = jax.random.normal(k_obs, (B, OBS_DIM), jnp.float32)            # flat obs
    rnn_states = jax.random.normal(k_rnn, (B, 2 * HIDDEN), jnp.float32)  # actor|critic

    # module init zeroes biases; bias_scale=0.1 perturbs them so the packed-bias path
    # is actually exercised by the correctness check (forward is param-agnostic).
    actor_params = init_net_params(k_actor, OBS_DIM, HIDDEN, NUM_ACTIONS, bias_scale=0.1)
    critic_params = init_net_params(k_critic, OBS_DIM, HIDDEN, 1, bias_scale=0.1)
    packed = pack_actor_critic(actor_params, critic_params, OBS_DIM, HIDDEN, NUM_ACTIONS)

    result = actor_critic_forward(obs, rnn_states, packed, k_sample,
                                  num_actions=NUM_ACTIONS)
    result = jax.block_until_ready(result)

    v_only = actor_critic_forward(obs, rnn_states, packed, k_sample,
                                  num_actions=NUM_ACTIONS, values_only=True)
    v_only = jax.block_until_ready(v_only)

    actor_rnn, critic_rnn = jnp.split(rnn_states, 2, axis=1)

    # Tight check against a reference that mirrors the kernel's bf16-weight matmuls.
    ref_logits_bf, ref_ha_bf = _ref_net(obs, actor_rnn, actor_params, jnp.bfloat16)
    ref_val_bf, ref_hc_bf = _ref_net(obs, critic_rnn, critic_params, jnp.bfloat16)
    assert jnp.allclose(result["action_logits"], ref_logits_bf, atol=2e-3)
    assert jnp.allclose(result["values"], ref_val_bf[:, 0], atol=2e-3)
    assert jnp.allclose(result["new_rnn_states"],
                        jnp.concatenate([ref_ha_bf, ref_hc_bf], axis=1), atol=2e-3)
    assert jnp.allclose(v_only["values"], ref_val_bf[:, 0], atol=2e-3)
    assert jnp.allclose(v_only["new_rnn_states"], ref_hc_bf, atol=2e-3)

    # Loose check against the exact f32 torch-semantics reference (the bf16 weight
    # cast is the only fidelity loss).
    ref_logits, ref_ha = _ref_net(obs, actor_rnn, actor_params)
    ref_val, ref_hc = _ref_net(obs, critic_rnn, critic_params)
    assert jnp.allclose(result["action_logits"], ref_logits, atol=0.1)
    assert jnp.allclose(result["values"], ref_val[:, 0], atol=0.1)

    assert result["values"].shape == (B,)
    assert result["actions"].shape == (B,)
    assert result["log_prob_actions"].shape == (B,)
    assert result["new_rnn_states"].shape == (B, 2 * HIDDEN)
    assert v_only["new_rnn_states"].shape == (B, HIDDEN)

    print("KERNEL_OK")
</pallas_src>

<mosaic_0001>
module attributes {stable_mosaic.version = 11 : i64} {
  func.func @_fused_ac_kernel(%arg0: i32, %arg1: i32, %arg2: memref<8x128xf32, #tpu.memory_space<vmem>>, %arg3: memref<1x8x128xf32, #tpu.memory_space<vmem>>, %arg4: memref<1x512x128xbf16, #tpu.memory_space<vmem>>, %arg5: memref<1x256x384xbf16, #tpu.memory_space<vmem>>, %arg6: memref<1x8x128xf32, #tpu.memory_space<vmem>>, %arg7: memref<1x8x256xf32, #tpu.memory_space<vmem>>) attributes {dimension_semantics = [#tpu.dimension_semantics<parallel>, #tpu.dimension_semantics<arbitrary>], iteration_bounds = array<i64: 2, 1>, scalar_prefetch = 0 : i64, scratch_operands = 0 : i64, tpu.core_type = #tpu.core_type<tc>, window_params = [{transform_indices = @transform_0, window_bounds = array<i64: 8, 128>}, {transform_indices = @transform_1, window_bounds = array<i64: 1, 8, 128>}, {transform_indices = @transform_2, window_bounds = array<i64: 1, 512, 128>}, {transform_indices = @transform_3, window_bounds = array<i64: 1, 256, 384>}, {transform_indices = @transform_4, window_bounds = array<i64: 1, 8, 128>}, {transform_indices = @transform_5, window_bounds = array<i64: 1, 8, 256>}]} {
    %c0 = arith.constant 0 : index
    %c0_0 = arith.constant 0 : index
    %0 = vector.load %arg2[%c0, %c0_0] : memref<8x128xf32, #tpu.memory_space<vmem>>, vector<8x128xf32>
    %c0_1 = arith.constant 0 : index
    %c0_2 = arith.constant 0 : index
    %c0_3 = arith.constant 0 : index
    %1 = vector.load %arg3[%c0_1, %c0_2, %c0_3] : memref<1x8x128xf32, #tpu.memory_space<vmem>>, vector<1x8x128xf32>
    %2 = vector.shape_cast %1 : vector<1x8x128xf32> to vector<8x128xf32>
    %c0_4 = arith.constant 0 : index
    %c0_5 = arith.constant 0 : index
    %c0_6 = arith.constant 0 : index
    %3 = vector.load %arg6[%c0_4, %c0_5, %c0_6] : memref<1x8x128xf32, #tpu.memory_space<vmem>>, vector<1x8x128xf32>
    %4 = vector.shape_cast %3 : vector<1x8x128xf32> to vector<8x128xf32>
    %c0_7 = arith.constant 0 : index
    %c0_8 = arith.constant 0 : index
    %c0_9 = arith.constant 0 : index
    %5 = vector.load %arg4[%c0_7, %c0_8, %c0_9] : memref<1x512x128xbf16, #tpu.memory_space<vmem>>, vector<1x128x128xbf16>
    %6 = vector.shape_cast %5 : vector<1x128x128xbf16> to vector<128x128xbf16>
    %7 = arith.truncf %0 : vector<8x128xf32> to vector<8x128xbf16>
    %cst = arith.constant dense<0.000000e+00> : vector<8x128xf32>
    %8 = tpu.matmul %7, %6, %cst {dimension_numbers = #tpu.dot_dimension_numbers<[1], [0], [0], [1], [0, 0, 1, 1], [], []>} : vector<8x128xbf16>, vector<128x128xbf16>, vector<8x128xf32> -> vector<8x128xf32>
    %9 = vector.extract_strided_slice %4 {offsets = [0, 0], sizes = [1, 128], strides = [1, 1]} : vector<8x128xf32> to vector<1x128xf32>
    %10 = vector.broadcast %9 : vector<1x128xf32> to vector<8x128xf32>
    %11 = arith.addf %8, %10 : vector<8x128xf32>
    %cst_10 = arith.constant 0.000000e+00 : f32
    %12 = vector.broadcast %cst_10 : f32 to vector<8x128xf32>
    %13 = arith.cmpf ogt, %11, %12 : vector<8x128xf32>
    %cst_11 = arith.constant 0.000000e+00 : f32
    %14 = vector.broadcast %cst_11 : f32 to vector<8x128xf32>
    %15 = arith.minimumf %11, %14 : vector<8x128xf32>
    %16 = math.exp %15 : vector<8x128xf32>
    %cst_12 = arith.constant 1.000000e+00 : f32
    %17 = vector.broadcast %cst_12 : f32 to vector<8x128xf32>
    %18 = arith.subf %16, %17 : vector<8x128xf32>
    %19 = arith.select %13, %11, %18 : vector<8x128xi1>, vector<8x128xf32>
    %c0_13 = arith.constant 0 : index
    %c128 = arith.constant 128 : index
    %c0_14 = arith.constant 0 : index
    %20 = vector.load %arg4[%c0_13, %c128, %c0_14] : memref<1x512x128xbf16, #tpu.memory_space<vmem>>, vector<1x128x128xbf16>
    %21 = vector.shape_cast %20 : vector<1x128x128xbf16> to vector<128x128xbf16>
    %22 = arith.truncf %19 : vector<8x128xf32> to vector<8x128xbf16>
    %cst_15 = arith.constant dense<0.000000e+00> : vector<8x128xf32>
    %23 = tpu.matmul %22, %21, %cst_15 {dimension_numbers = #tpu.dot_dimension_numbers<[1], [0], [0], [1], [0, 0, 1, 1], [], []>} : vector<8x128xbf16>, vector<128x128xbf16>, vector<8x128xf32> -> vector<8x128xf32>
    %24 = vector.extract_strided_slice %4 {offsets = [1, 0], sizes = [1, 128], strides = [1, 1]} : vector<8x128xf32> to vector<1x128xf32>
    %25 = vector.broadcast %24 : vector<1x128xf32> to vector<8x128xf32>
    %26 = arith.addf %23, %25 : vector<8x128xf32>
    %cst_16 = arith.constant 0.000000e+00 : f32
    %27 = vector.broadcast %cst_16 : f32 to vector<8x128xf32>
    %28 = arith.cmpf ogt, %26, %27 : vector<8x128xf32>
    %cst_17 = arith.constant 0.000000e+00 : f32
    %29 = vector.broadcast %cst_17 : f32 to vector<8x128xf32>
    %30 = arith.minimumf %26, %29 : vector<8x128xf32>
    %31 = math.exp %30 : vector<8x128xf32>
    %cst_18 = arith.constant 1.000000e+00 : f32
    %32 = vector.broadcast %cst_18 : f32 to vector<8x128xf32>
    %33 = arith.subf %31, %32 : vector<8x128xf32>
    %34 = arith.select %28, %26, %33 : vector<8x128xi1>, vector<8x128xf32>
    %c0_19 = arith.constant 0 : index
    %c0_20 = arith.constant 0 : index
    %c0_21 = arith.constant 0 : index
    %35 = vector.load %arg5[%c0_19, %c0_20, %c0_21] : memref<1x256x384xbf16, #tpu.memory_space<vmem>>, vector<1x128x384xbf16>
    %36 = vector.shape_cast %35 : vector<1x128x384xbf16> to vector<128x384xbf16>
    %37 = arith.truncf %34 : vector<8x128xf32> to vector<8x128xbf16>
    %cst_22 = arith.constant dense<0.000000e+00> : vector<8x384xf32>
    %38 = tpu.matmul %37, %36, %cst_22 {dimension_numbers = #tpu.dot_dimension_numbers<[1], [0], [0], [1], [0, 0, 1, 1], [], []>} : vector<8x128xbf16>, vector<128x384xbf16>, vector<8x384xf32> -> vector<8x384xf32>
    %c0_23 = arith.constant 0 : index
    %c128_24 = arith.constant 128 : index
    %c0_25 = arith.constant 0 : index
    %39 = vector.load %arg5[%c0_23, %c128_24, %c0_25] : memref<1x256x384xbf16, #tpu.memory_space<vmem>>, vector<1x128x384xbf16>
    %40 = vector.shape_cast %39 : vector<1x128x384xbf16> to vector<128x384xbf16>
    %41 = arith.truncf %2 : vector<8x128xf32> to vector<8x128xbf16>
    %cst_26 = arith.constant dense<0.000000e+00> : vector<8x384xf32>
    %42 = tpu.matmul %41, %40, %cst_26 {dimension_numbers = #tpu.dot_dimension_numbers<[1], [0], [0], [1], [0, 0, 1, 1], [], []>} : vector<8x128xbf16>, vector<128x384xbf16>, vector<8x384xf32> -> vector<8x384xf32>
    %43 = vector.extract_strided_slice %38 {offsets = [0, 0], sizes = [8, 128], strides = [1, 1]} : vector<8x384xf32> to vector<8x128xf32>
    %44 = vector.extract_strided_slice %42 {offsets = [0, 0], sizes = [8, 128], strides = [1, 1]} : vector<8x384xf32> to vector<8x128xf32>
    %45 = arith.addf %43, %44 : vector<8x128xf32>
    %46 = vector.extract_strided_slice %4 {offsets = [2, 0], sizes = [1, 128], strides = [1, 1]} : vector<8x128xf32> to vector<1x128xf32>
    %47 = vector.broadcast %46 : vector<1x128xf32> to vector<8x128xf32>
    %48 = arith.addf %45, %47 : vector<8x128xf32>
    %49 = arith.negf %48 : vector<8x128xf32>
    %50 = math.exp %49 : vector<8x128xf32>
    %cst_27 = arith.constant 1.000000e+00 : f32
    %51 = vector.broadcast %cst_27 : f32 to vector<8x128xf32>
    %52 = arith.addf %51, %50 : vector<8x128xf32>
    %53 = arith.divf %51, %52 : vector<8x128xf32>
    %54 = vector.extract_strided_slice %38 {offsets = [0, 128], sizes = [8, 128], strides = [1, 1]} : vector<8x384xf32> to vector<8x128xf32>
    %55 = vector.extract_strided_slice %42 {offsets = [0, 128], sizes = [8, 128], strides = [1, 1]} : vector<8x384xf32> to vector<8x128xf32>
    %56 = arith.addf %54, %55 : vector<8x128xf32>
    %57 = vector.extract_strided_slice %4 {offsets = [3, 0], sizes = [1, 128], strides = [1, 1]} : vector<8x128xf32> to vector<1x128xf32>
    %58 = vector.broadcast %57 : vector<1x128xf32> to vector<8x128xf32>
    %59 = arith.addf %56, %58 : vector<8x128xf32>
    %60 = arith.negf %59 : vector<8x128xf32>
    %61 = math.exp %60 : vector<8x128xf32>
    %cst_28 = arith.constant 1.000000e+00 : f32
    %62 = vector.broadcast %cst_28 : f32 to vector<8x128xf32>
    %63 = arith.addf %62, %61 : vector<8x128xf32>
    %64 = arith.divf %62, %63 : vector<8x128xf32>
    %65 = vector.extract_strided_slice %38 {offsets = [0, 256], sizes = [8, 128], strides = [1, 1]} : vector<8x384xf32> to vector<8x128xf32>
    %66 = vector.extract_strided_slice %4 {offsets = [4, 0], sizes = [1, 128], strides = [1, 1]} : vector<8x128xf32> to vector<1x128xf32>
    %67 = vector.broadcast %66 : vector<1x128xf32> to vector<8x128xf32>
    %68 = arith.addf %65, %67 : vector<8x128xf32>
    %69 = vector.extract_strided_slice %42 {offsets = [0, 256], sizes = [8, 128], strides = [1, 1]} : vector<8x384xf32> to vector<8x128xf32>
    %70 = vector.extract_strided_slice %4 {offsets = [5, 0], sizes = [1, 128], strides = [1, 1]} : vector<8x128xf32> to vector<1x128xf32>
    %71 = vector.broadcast %70 : vector<1x128xf32> to vector<8x128xf32>
    %72 = arith.addf %69, %71 : vector<8x128xf32>
    %73 = arith.mulf %53, %72 : vector<8x128xf32>
    %74 = arith.addf %68, %73 : vector<8x128xf32>
    %75 = math.tanh %74 : vector<8x128xf32>
    %cst_29 = arith.constant 1.000000e+00 : f32
    %76 = vector.broadcast %cst_29 : f32 to vector<8x128xf32>
    %77 = arith.subf %76, %64 : vector<8x128xf32>
    %78 = arith.mulf %77, %75 : vector<8x128xf32>
    %79 = arith.mulf %64, %2 : vector<8x128xf32>
    %80 = arith.addf %78, %79 : vector<8x128xf32>
    %c0_30 = arith.constant 0 : index
    %c256 = arith.constant 256 : index
    %c0_31 = arith.constant 0 : index
    %81 = vector.load %arg4[%c0_30, %c256, %c0_31] : memref<1x512x128xbf16, #tpu.memory_space<vmem>>, vector<1x128x128xbf16>
    %82 = vector.shape_cast %81 : vector<1x128x128xbf16> to vector<128x128xbf16>
    %83 = arith.truncf %80 : vector<8x128xf32> to vector<8x128xbf16>
    %cst_32 = arith.constant dense<0.000000e+00> : vector<8x128xf32>
    %84 = tpu.matmul %83, %82, %cst_32 {dimension_numbers = #tpu.dot_dimension_numbers<[1], [0], [0], [1], [0, 0, 1, 1], [], []>} : vector<8x128xbf16>, vector<128x128xbf16>, vector<8x128xf32> -> vector<8x128xf32>
    %85 = vector.extract_strided_slice %4 {offsets = [6, 0], sizes = [1, 128], strides = [1, 1]} : vector<8x128xf32> to vector<1x128xf32>
    %86 = vector.broadcast %85 : vector<1x128xf32> to vector<8x128xf32>
    %87 = arith.addf %84, %86 : vector<8x128xf32>
    %cst_33 = arith.constant 0.000000e+00 : f32
    %88 = vector.broadcast %cst_33 : f32 to vector<8x128xf32>
    %89 = arith.cmpf ogt, %87, %88 : vector<8x128xf32>
    %cst_34 = arith.constant 0.000000e+00 : f32
    %90 = vector.broadcast %cst_34 : f32 to vector<8x128xf32>
    %91 = arith.minimumf %87, %90 : vector<8x128xf32>
    %92 = math.exp %91 : vector<8x128xf32>
    %cst_35 = arith.constant 1.000000e+00 : f32
    %93 = vector.broadcast %cst_35 : f32 to vector<8x128xf32>
    %94 = arith.subf %92, %93 : vector<8x128xf32>
    %95 = arith.select %89, %87, %94 : vector<8x128xi1>, vector<8x128xf32>
    %c0_36 = arith.constant 0 : index
    %c384 = arith.constant 384 : index
    %c0_37 = arith.constant 0 : index
    %96 = vector.load %arg4[%c0_36, %c384, %c0_37] : memref<1x512x128xbf16, #tpu.memory_space<vmem>>, vector<1x128x128xbf16>
    %97 = vector.shape_cast %96 : vector<1x128x128xbf16> to vector<128x128xbf16>
    %98 = arith.truncf %95 : vector<8x128xf32> to vector<8x128xbf16>
    %cst_38 = arith.constant dense<0.000000e+00> : vector<8x128xf32>
    %99 = tpu.matmul %98, %97, %cst_38 {dimension_numbers = #tpu.dot_dimension_numbers<[1], [0], [0], [1], [0, 0, 1, 1], [], []>} : vector<8x128xbf16>, vector<128x128xbf16>, vector<8x128xf32> -> vector<8x128xf32>
    %100 = vector.extract_strided_slice %4 {offsets = [7, 0], sizes = [1, 128], strides = [1, 1]} : vector<8x128xf32> to vector<1x128xf32>
    %101 = vector.broadcast %100 : vector<1x128xf32> to vector<8x128xf32>
    %102 = arith.addf %99, %101 : vector<8x128xf32>
    %c0_39 = arith.constant 0 : index
    %c0_40 = arith.constant 0 : index
    %c0_41 = arith.constant 0 : index
    %103 = vector.load %arg7[%c0_39, %c0_40, %c0_41] : memref<1x8x256xf32, #tpu.memory_space<vmem>>, vector<1x8x128xf32>
    %104 = vector.shape_cast %103 : vector<1x8x128xf32> to vector<8x128xf32>
    %105 = vector.shape_cast %102 : vector<8x128xf32> to vector<1x8x128xf32>
    tpu.vector_store %arg7[%c0_39, %c0_40, %c0_41], %105 {strides = array<i32>} : memref<1x8x256xf32, #tpu.memory_space<vmem>>, vector<1x8x128xf32>,
    %c0_42 = arith.constant 0 : index
    %c0_43 = arith.constant 0 : index
    %c128_44 = arith.constant 128 : index
    %106 = vector.load %arg7[%c0_42, %c0_43, %c128_44] : memref<1x8x256xf32, #tpu.memory_space<vmem>>, vector<1x8x128xf32>
    %107 = vector.shape_cast %106 : vector<1x8x128xf32> to vector<8x128xf32>
    %108 = vector.shape_cast %80 : vector<8x128xf32> to vector<1x8x128xf32>
    tpu.vector_store %arg7[%c0_42, %c0_43, %c128_44], %108 {strides = array<i32>} : memref<1x8x256xf32, #tpu.memory_space<vmem>>, vector<1x8x128xf32>,
    return
  }
  func.func @transform_0(%arg0: i32, %arg1: i32) -> (i32, i32) {
    %c0_i32 = arith.constant 0 : i32
    %c0_i32_0 = arith.constant 0 : i32
    return %arg1, %c0_i32 : i32, i32
  }
  func.func @transform_1(%arg0: i32, %arg1: i32) -> (i32, i32, i32) {
    %c0_i32 = arith.constant 0 : i32
    %c0_i32_0 = arith.constant 0 : i32
    return %arg0, %arg1, %c0_i32 : i32, i32, i32
  }
  func.func @transform_2(%arg0: i32, %arg1: i32) -> (i32, i32, i32) {
    %c0_i32 = arith.constant 0 : i32
    %c0_i32_0 = arith.constant 0 : i32
    %c0_i32_1 = arith.constant 0 : i32
    return %arg0, %c0_i32, %c0_i32_0 : i32, i32, i32
  }
  func.func @transform_3(%arg0: i32, %arg1: i32) -> (i32, i32, i32) {
    %c0_i32 = arith.constant 0 : i32
    %c0_i32_0 = arith.constant 0 : i32
    %c0_i32_1 = arith.constant 0 : i32
    return %arg0, %c0_i32, %c0_i32_0 : i32, i32, i32
  }
  func.func @transform_4(%arg0: i32, %arg1: i32) -> (i32, i32, i32) {
    %c0_i32 = arith.constant 0 : i32
    %c0_i32_0 = arith.constant 0 : i32
    %c0_i32_1 = arith.constant 0 : i32
    return %arg0, %c0_i32, %c0_i32_0 : i32, i32, i32
  }
  func.func @transform_5(%arg0: i32, %arg1: i32) -> (i32, i32, i32) {
    %c0_i32 = arith.constant 0 : i32
    %c0_i32_0 = arith.constant 0 : i32
    return %arg0, %arg1, %c0_i32 : i32, i32, i32
  }
}

</mosaic_0001>

<bundles_post_ra>
// kernel: actor_critic_forward.1
= control target key start
LH: loop header
LB: loop body
LE: loop exit
PB: predicated region body
PF: predicated region fallthrough
CT: control target
= control target key end

     0   :  { %10 = vsyncpa [#allocation3], 0  ;;  %s2491_s0 = inlined_call_operand.vmem [shape: f32[8,128], index: 0, kind: input, shape index: {}]   ;;  %s2492_s1 = inlined_call_operand.vmem [shape: f32[2,8,128], index: 1, kind: input, shape index: {}]   ;;  %s2493_s2 = inlined_call_operand.hbm [shape: bf16[2,512,128], index: 2, kind: input, shape index: {}]   ;;  %s2494_s3 = inlined_call_operand.hbm [shape: bf16[2,256,384], index: 3, kind: input, shape index: {}]   ;;  %s2495_s4 = inlined_call_operand.vmem [shape: f32[2,8,128], index: 4, kind: input, shape index: {}]   ;;  %s2496_s5 = inlined_call_operand.vmem [shape: f32[2,8,256], index: 5, kind: output, shape index: {}]  }
   0x1   :  { %12 = vsyncpa [#allocation3 + $0x1], 0 }
   0x2   :  { %13 = vsyncpa [#allocation5], 0 }
   0x3   :  { %15 = vsyncpa [#allocation5 + $0x1], 0  ;;  %s2129_s18 = smov 0   ;;  %s2131_s19 = smov 0  }
   0x4   :  { %s2133_s20 = smov 0   ;;  %s2135_s21 = smov 0  }
   0x5   :  { %s2137_s22 = smov 0   ;;  %s2139_s23 = smov 0  }
   0x6 LB: > { %s1514_s24 = sadd.s32 4294967295, %s2088_s23   ;;  %s33_s25 = sadd.s32 1, %s2084_s22  ;;  %s2088_s23 = sphi %s2139_s23, %s21_s23   ;;  %s2084_s22 = sphi %s2137_s22, %s2507_s22   ;;  %s2080_s21 = sphi %s2135_s21, %s2506_s21   ;;  %s2076_s20 = sphi %s2133_s20, %s2505_s20   ;;  %s2072_s19 = sphi %s2131_s19, %s2504_s19   ;;  %s2068_s18 = sphi %s2129_s18, %s2503_s18  }
   0x7   : > { %p35_p0 = scmp.ge.s32.totalorder %s33_s25, 2  ;;  %s94_s26 = sadd.s32 1, %s2076_s20 }
   0x8   : > { %p101_p1 = scmp.ne.s32.totalorder %s2076_s20, %s2072_s19  ;;  %p102_p2 = scmp.eq.s32.totalorder %s2088_s23, 0 }
   0x9   : > { %s2509_s25 = smov (%p35_p0, %s33_s25), 0  ;;  %p107_p4 = scmp.ne.s32.totalorder %s2072_s19, %s2068_s18 }
   0xa   : > { %p2165_p3 = por %p102_p2, %p101_p1  ;;  %s91_s28 = ssub.s32 %s2084_s22, %s2509_s25 }
   0xb   : > { %p108_p5 = scmp.eq.s32.totalorder %s1514_s24, 0  ;;  %p92_p6 = scmp.eq.s32.totalorder %s91_s28, 0 }
   0xc   : > { %p1806_p8 = scmp.lt.s32.totalorder %s2088_s23, 2  ;;  %s2181_s6 = sand.u32 1, %s2076_s20  }
   0xd   : > { %p2172_p7 = por %p108_p5, %p107_p4  ;;  %s1616_s7 = sshll.u32 %s2084_s22, 12 }
   0xe   : > { %s2178_s30 = scalar_select %p92_p6, %s2076_s20, %s94_s26  }
   0xf   : > { %s2499_s29 = scalar_select %p2172_p7, 1, 0 }
  0x10   : > { %s1519_s8 = sshll.u32 %s2181_s6, 8  ;;  %s2188_s11 = scalar_lea.hbm %s2493_s2, %s1616_s7 }
  0x11   : > { %s232_s12 = scalar_lea.vmem [#allocation2], %s1519_s8  ;;  %p2192_p9 = pnand %p1806_p8, %p2165_p3 }
  0x12   : > { %s239_s13 = sshll.u32 %s232_s12, 4  ;;  %s229_s15 = scalar_lea.sflag [#allocation3], %s2181_s6  ;;  %s2196_s13 = int_to_ptr.vmem [resolvable:$true] %s239_s13 }
  0x13   : > { %s1974_s16 = scalar_lea.hbm %s2188_s11, 4096  ;;  %p1976_p11 = pneg %p2192_p9 }
  0x14   : > { %p1975_p10 = scmp.ne.s32.totalorder %s2188_s11, %s1974_s16  ;;  %s1979_s24 = scalar_lea.hbm %s2493_s2, 8192 }
  0x15   : > { %p1980_p0 = scmp.lt.u32.totalorder %s2188_s11, %s2493_s2  ;;  %p1981_p1 = scmp.lt.u32.totalorder %s1979_s24, %s1974_s16 }
  0x16   : > { %p1977_p12 = pnand %p1976_p11, %p1975_p10  ;;  %p1983_p3 = scmp.lt.u32.totalorder %s1974_s16, %s2188_s11 }
  0x17   : > { %p1982_p2 = por %p1981_p1, %p1980_p0 }
  0x18   : > { %p1978_p13 = pneg %p1977_p12 }
  0x19   : > { %p1984_p4 = por %p1983_p3, %p1982_p2 }
  0x1b   : > { %p1985_p5 = pnand %p1984_p4, %p1978_p13 }
  0x1d   : > { %1988 = shalt.err (!%p1985_p5)
}
  0x1e   : > { %s1989_s28 = scalar_lea.vmem %s2196_s13, 4096  ;;  %s2090_s7 = smov [#allocation2]  }
  0x1f   : > { %p1990_p6 = scmp.ne.s32.totalorder %s2196_s13, %s1989_s28  ;;  %s1994_s8 = sshll.u32 %s2090_s7, 4  ;;  %s1995_s8 = int_to_ptr.vmem [resolvable:$false] %s1994_s8 }
  0x20   : > { %s1996_s9 = scalar_lea.vmem %s1995_s8, 8192  ;;  %p1997_p12 = scmp.lt.s32.totalorder %s2196_s13, %s1995_s8 }
  0x21   : > { %p1992_p8 = pnand %p1990_p6, %p1976_p11  ;;  %p1998_p0 = scmp.lt.s32.totalorder %s1996_s9, %s1989_s28 }
  0x23   : > { %p1993_p10 = pneg %p1992_p8  ;;  %p1999_p1 = por %p1998_p0, %p1997_p12 }
  0x25   : > { %p2000_p2 = pnand %p1999_p1, %p1993_p10 }
  0x27   : > { %2003 = shalt.err (!%p2000_p2)
}
  0x28   : > { %s2091_s10 = smov 64   ;;  %s2092_s12 = smov 4  }
  0x29   : > { %1802 = dma.hbm_to_vmem [thread:$0]  (!%p2192_p9), %s2188_s11, 4096, %s2196_s13, %s229_s15, %s2091_s10, %s2091_s10, %s2092_s12  }
  0x2a   : > { %p1523_p13 = scmp.ge.s32.totalorder %s2088_s23, 1  ;;  %p275_p3 = scmp.lt.s32.totalorder %s2088_s23, 3 }
  0x2b   : > { %s1792_s16 = smul.u32 384, %s2181_s6  ;;  %s250_s11 = scalar_lea.sflag [#allocation5], %s2181_s6 }
  0x2c   : > { %p2229_p4 = pnand %p1523_p13, %p275_p3  ;;  %s1793_s18 = smul.u32 6144, %s2084_s22 }
  0x2d   : > { %s253_s28 = scalar_lea.vmem [#allocation4], %s1792_s16  ;;  %s2009_s9 = scalar_lea.hbm %s2494_s3, 12288 }
  0x2e   : > { %s2237_s27 = scalar_lea.hbm %s2494_s3, %s1793_s18  ;;  %s260_s7 = sshll.u32 %s253_s28, 4  ;;  %s2239_s7 = int_to_ptr.vmem [resolvable:$true] %s260_s7 }
  0x2f   : > { %s2004_s13 = scalar_lea.hbm %s2237_s27, 6144  ;;  %p2010_p10 = scmp.lt.u32.totalorder %s2237_s27, %s2494_s3 }
  0x30   : > { %p2005_p5 = scmp.ne.s32.totalorder %s2237_s27, %s2004_s13  ;;  %p2011_p12 = scmp.lt.u32.totalorder %s2009_s9, %s2004_s13 }
  0x31   : > { %p2013_p1 = scmp.lt.u32.totalorder %s2004_s13, %s2237_s27 }
  0x32   : > { %p2007_p6 = pnand %p2005_p5, %p1976_p11  ;;  %p2012_p0 = por %p2011_p12, %p2010_p10 }
  0x34   : > { %p2008_p8 = pneg %p2007_p6  ;;  %p2014_p2 = por %p2013_p1, %p2012_p0 }
  0x36   : > { %p2015_p13 = pnand %p2014_p2, %p2008_p8 }
  0x38   : > { %2018 = shalt.err (!%p2015_p13)
}
  0x39   : > { %s2019_s16 = scalar_lea.vmem %s2239_s7, 6144  ;;  %s2093_s18 = smov [#allocation4]  }
  0x3a   : > { %p2020_p3 = scmp.ne.s32.totalorder %s2239_s7, %s2019_s16  ;;  %s2024_s24 = sshll.u32 %s2093_s18, 4  ;;  %s2025_s24 = int_to_ptr.vmem [resolvable:$false] %s2024_s24 }
  0x3b   : > { %s2026_s26 = scalar_lea.vmem %s2025_s24, 12288  ;;  %p2027_p7 = scmp.lt.s32.totalorder %s2239_s7, %s2025_s24 }
  0x3c   : > { %p2022_p5 = pnand %p2020_p3, %p1976_p11  ;;  %p2028_p10 = scmp.lt.s32.totalorder %s2026_s26, %s2019_s16 }
  0x3e   : > { %p2023_p6 = pneg %p2022_p5  ;;  %p2029_p12 = por %p2028_p10, %p2027_p7 }
  0x40   : > { %p2030_p0 = pnand %p2029_p12, %p2023_p6 }
  0x42   : > { %2033 = shalt.err (!%p2030_p0)
}
  0x43   : > { %s2094_s28 = smov 192   ;;  %s2095_s13 = smov 12  }
  0x44   : > { %1805 = dma.hbm_to_vmem [thread:$0]  (!%p2192_p9), %s2237_s27, 6144, %s2239_s7, %s250_s11, %s2094_s28, %s2094_s28, %s2095_s13  }
  0x45   : > { %279 = sbr.rel (%p2229_p4) target bundleno = 1327 (0x52f), region = 40  ;;  %s281_s15 = sand.u32 (!%p2229_p4), 1, %s2072_s19  }
  0x46   : > { %s1524_s8 = sshll.u32 (!%p2229_p4), %s281_s15, 8  ;;  %s282_s9 = scalar_lea.sflag (!%p2229_p4), [#allocation3], %s281_s15 }
  0x47   : > { %s2270_s10 = scalar_lea.vmem (!%p2229_p4), [#allocation2], %s1524_s8  ;;  %p2502_p7 = scmp.ne.s32.totalorder (!%p2229_p4), %s2499_s29, 0 }
  0x4c   : > { %2059 = dma.done.wait (%p2502_p7), %s282_s9, 4096  }
  0x4d   : > { %2061 = vsyncadd (%p2502_p7), %s282_s9, 4294963200  ;;  %s1794_s12 = smul.u32 384, %s281_s15  ;;  %s291_s14 = scalar_lea.sflag [#allocation5], %s281_s15 }
  0x4f   : > { %s2276_s6 = scalar_lea.vmem [#allocation4], %s1794_s12 }
  0x50   : > { %2063 = dma.done.wait (%p2502_p7), %s291_s14, 6144  }
  0x51   : > { %2065 = vsyncadd (%p2502_p7), %s291_s14, 4294961152  ;;  %v2096_v0 = vmov 0.0   ;;  %vm2097_vm0 = vmmov 0   ;;  %v1862_v1 = vld [vmem:[%s2270_s10] sm:$0xff]   ;;  %v1863_v2 = vld [vmem:[%s2270_s10 + $0x8] sm:$0xff]   ;;  %p349_p9 = scmp.lt.s32.totalorder %s2080_s21, 1  ;;  %v390_v25 = vlaneseq }
  0x52   : > { %1672 = vmatprep.subr.bf16.mxu0 %v2096_v0  ;;  %1688 = vmatprep.mubr.msk.bf16.mxu0 %vm2097_vm0, %v2096_v0  ;;  %v1864_v3 = vld [vmem:[%s2270_s10 + $0x10] sm:$0xff]   ;;  %v1870_v4 = vld [vmem:[%s2270_s10 + $0x40] sm:$0xff]   ;;  %v1865_v5 = vld [vmem:[%s2270_s10 + $0x18] sm:$0xff]   ;;  %v2098_v60 = vmov 0  }
  0x53   : > { %1692 = vmatprep.subr.bf16.mxu1 %v2096_v0  ;;  %1708 = vmatprep.mubr.msk.bf16.mxu1 %vm2097_vm0, %v2096_v0  ;;  %v1871_v6 = vld [vmem:[%s2270_s10 + $0x48] sm:$0xff]   ;;  %v1866_v7 = vld [vmem:[%s2270_s10 + $0x20] sm:$0xff]   ;;  %v1868_v9 = vld [vmem:[%s2270_s10 + $0x30] sm:$0xff]   ;;  %s2511_s21 = smov (!%p349_p9, %s2080_s21), 1  ;;  %v2333_v26 = vshrl.u32 %v390_v25, 7 }
  0x54   : > { %1673 = vmatpush3.bf16.msra.mxu0 %v1862_v1  ;;  %1693 = vmatpush3.bf16.msra.mxu1 %v1870_v4  ;;  %v1867_v8 = vld [vmem:[%s2270_s10 + $0x28] sm:$0xff]   ;;  %v1869_v10 = vld [vmem:[%s2270_s10 + $0x38] sm:$0xff]   ;;  %v370_v11 = vld [vmem:[%s2491_s0] sm:$0xff]  ;;  %s1525_s27 = sshll.u32 %s2511_s21, 3  ;;  %s1617_s28 = sshll.u32 %s2511_s21, 4 }
  0x55   : > { %1674 = vmatprep.subr.bf16.mxu0 %v2096_v0  ;;  %1694 = vmatprep.subr.bf16.mxu1 %v2096_v0  ;;  %v389_v12 = vpack.c.bf16 %v370_v11, %v370_v11  ;;  %v1872_v13 = vld [vmem:[%s2270_s10 + $0x50] sm:$0xff]   ;;  %v1873_v14 = vld [vmem:[%s2270_s10 + $0x58] sm:$0xff]   ;;  %v1874_v15 = vld [vmem:[%s2270_s10 + $0x60] sm:$0xff]   ;;  %s359_s16 = scalar_lea.vmem %s2495_s4, %s1525_s27  ;;  %v392_v27 = vsub.s32 0, %v2333_v26  ;;  %v507_v61 = vsub.s32 1, %v2333_v26  ;;  %s355_s26 = scalar_lea.vmem %s2492_s1, %s1525_s27 }
  0x56   : > { %v1875_v16 = vld [vmem:[%s2270_s10 + $0x68] sm:$0xff]   ;;  %v1876_v17 = vld [vmem:[%s2270_s10 + $0x70] sm:$0xff]   ;;  %v1877_v18 = vld [vmem:[%s2270_s10 + $0x78] sm:$0xff]   ;;  %s2454_s8 = scalar_lea.vmem %s2496_s5, %s1617_s28 }
  0x57   : > { %v1878_v19 = vld [vmem:[%s2276_s6] ss:$12 sps:$4 sm:$0xff]   ;;  %v1880_v20 = vld [vmem:[%s2276_s6 + $0x4] ss:$12 sps:$4 sm:$0xff]   ;;  %v1884_v21 = vld [vmem:[%s2276_s6 + $0x1c] ss:$12 sps:$4 sm:$0xff]  }
  0x58   : > { %1675 = vmatpush3.bf16.msra.mxu0 %v1863_v2  ;;  %1695 = vmatpush3.bf16.msra.mxu1 %v1871_v6  ;;  %v1882_v22 = vld [vmem:[%s2276_s6 + $0x18] ss:$12 sps:$4 sm:$0xff]   ;;  %v1888_v23 = vld [vmem:[%s2276_s6 + $0x34] ss:$12 sps:$4 sm:$0xff]   ;;  %v1886_v24 = vld [vmem:[%s2276_s6 + $0x30] ss:$12 sps:$4 sm:$0xff]  }
  0x59   : > { %1676 = vmatprep.subr.bf16.mxu0 %v2096_v0  ;;  %1696 = vmatprep.subr.bf16.mxu1 %v2096_v0  ;;  %v2341_v28 = vld [vmem:[%s359_s16] sm:$0xff]  ;;  %v1881_v40 = vld [vmem:[%s2276_s6 + $0x8] ss:$12 sps:$4 sm:$0xff]   ;;  %v1892_v44 = vld [vmem:[%s2276_s6 + $0x4c] ss:$12 sps:$4 sm:$0xff]  }
  0x5a   : > { %v393_v29 = vrot.slane %v2341_v28, %v392_v27  ;;  %v1885_v42 = vld [vmem:[%s2276_s6 + $0x20] ss:$12 sps:$4 sm:$0xff]   ;;  %v1889_v43 = vld [vmem:[%s2276_s6 + $0x38] ss:$12 sps:$4 sm:$0xff]   ;;  %v1890_v45 = vld [vmem:[%s2276_s6 + $0x48] ss:$12 sps:$4 sm:$0xff]   ;;  %v508_v62 = vrot.slane %v2341_v28, %v507_v61 }
  0x5b   : > { %v1893_v46 = vld [vmem:[%s2276_s6 + $0x50] ss:$12 sps:$4 sm:$0xff]   ;;  %v1894_v48 = vld [vmem:[%s2276_s6 + $0x60] ss:$12 sps:$4 sm:$0xff]   ;;  %v1897_v49 = vld [vmem:[%s2276_s6 + $0x68] ss:$12 sps:$4 sm:$0xff]  }
  0x5c   : > { %1677 = vmatpush3.bf16.msra.mxu0 %v1864_v3  ;;  %1697 = vmatpush3.bf16.msra.mxu1 %v1872_v13  ;;  %v1896_v47 = vld [vmem:[%s2276_s6 + $0x64] ss:$12 sps:$4 sm:$0xff]   ;;  %v1900_v50 = vld [vmem:[%s2276_s6 + $0x7c] ss:$12 sps:$4 sm:$0xff]   ;;  %v1901_v52 = vld [vmem:[%s2276_s6 + $0x80] ss:$12 sps:$4 sm:$0xff]  }
  0x5d   : > { %1678 = vmatprep.subr.bf16.mxu0 %v2096_v0  ;;  %1698 = vmatprep.subr.bf16.mxu1 %v2096_v0  ;;  %v1898_v51 = vld [vmem:[%s2276_s6 + $0x78] ss:$12 sps:$4 sm:$0xff]   ;;  %v1904_v53 = vld [vmem:[%s2276_s6 + $0x94] ss:$12 sps:$4 sm:$0xff]   ;;  %v1902_v54 = vld [vmem:[%s2276_s6 + $0x90] ss:$12 sps:$4 sm:$0xff]  }
  0x5e   : > { %v1905_v55 = vld [vmem:[%s2276_s6 + $0x98] ss:$12 sps:$4 sm:$0xff]   ;;  %v1906_v57 = vld [vmem:[%s2276_s6 + $0xa8] ss:$12 sps:$4 sm:$0xff]   ;;  %v1909_v58 = vld [vmem:[%s2276_s6 + $0xb0] ss:$12 sps:$4 sm:$0xff]  }
  0x5f   : > { %v1908_v56 = vld [vmem:[%s2276_s6 + $0xac] ss:$12 sps:$4 sm:$0xff]   ;;  %v1912_v59 = vld [vmem:[%s2276_s6 + $0xc4] ss:$12 sps:$4 sm:$0xff]   ;;  %v1931_v11 = vld [vmem:[%s2276_s6 + $0xc8] ss:$12 sps:$4 sm:$0xff]  }
  0x60   : > { %1679 = vmatpush3.bf16.msra.mxu0 %v1865_v5  ;;  %1699 = vmatpush3.bf16.msra.mxu1 %v1873_v14  ;;  %v1915_v13 = vld [vmem:[%s2276_s6 + $0xdc] ss:$12 sps:$4 sm:$0xff]   ;;  %v1913_v14 = vld [vmem:[%s2276_s6 + $0xd8] ss:$12 sps:$4 sm:$0xff]  }
  0x61   : > { %1680 = vmatprep.subr.bf16.mxu0 %v2096_v0  ;;  %1700 = vmatprep.subr.bf16.mxu1 %v2096_v0  ;;  %v1927_v25 = vld [vmem:[%s2276_s6 + $0x13c] ss:$12 sps:$4 sm:$0xff]   ;;  %v1925_v27 = vld [vmem:[%s2276_s6 + $0x138] ss:$12 sps:$4 sm:$0xff]  }
  0x64   : > { %1681 = vmatpush3.bf16.msra.mxu0 %v1866_v7  ;;  %1701 = vmatpush3.bf16.msra.mxu1 %v1874_v15  ;;  %v1935_v15 = vld [vmem:[%s2276_s6 + $0xe0] ss:$12 sps:$4 sm:$0xff]  }
  0x65   : > { %1682 = vmatprep.subr.bf16.mxu0 %v2096_v0  ;;  %1702 = vmatprep.subr.bf16.mxu1 %v2096_v0 }
  0x68   : > { %1683 = vmatpush3.bf16.msra.mxu0 %v1867_v8  ;;  %1703 = vmatpush3.bf16.msra.mxu1 %v1875_v16  ;;  %v1918_v16 = vld [vmem:[%s2276_s6 + $0xf4] ss:$12 sps:$4 sm:$0xff]  }
  0x69   : > { %1684 = vmatprep.subr.bf16.mxu0 %v2096_v0  ;;  %1704 = vmatprep.subr.bf16.mxu1 %v2096_v0 }
  0x6c   : > { %1685 = vmatpush3.bf16.msra.mxu0 %v1868_v9  ;;  %1705 = vmatpush3.bf16.msra.mxu1 %v1876_v17  ;;  %v1916_v17 = vld [vmem:[%s2276_s6 + $0xf0] ss:$12 sps:$4 sm:$0xff]  }
  0x6d   : > { %1686 = vmatprep.subr.bf16.mxu0 %v2096_v0  ;;  %1706 = vmatprep.subr.bf16.mxu1 %v2096_v0 }
  0x70   : > { %1687 = vmatpush3.bf16.msra.mxu0 %v1869_v10  ;;  %1707 = vmatpush3.bf16.msra.mxu1 %v1877_v18  ;;  %v1910_v10 = vld [vmem:[%s2276_s6 + $0xc0] ss:$12 sps:$4 sm:$0xff]   ;;  %v1936_v18 = vld [vmem:[%s2276_s6 + $0xf8] ss:$12 sps:$4 sm:$0xff]  }
  0x71   : > { %1712 = vmatprep.subr.bf16.mxu1 %v2096_v0  ;;  %764 = vmatprep.subr.bf16.mxu0 %v1880_v20  ;;  %v1919_v20 = vld [vmem:[%s2276_s6 + $0x108] ss:$12 sps:$4 sm:$0xff]  }
  0x73   : > { %1689 = vmatmul.mubr.bf16.vlgmr.msra.gmra.mrb[0].mxu0 %v389_v12 }
  0x74   : > { %765 = vmatpush1.bf16.msra.mxu0 %v1878_v19  ;;  %796 = vmatprep.mubr.bf16.mxu0 %v2098_v60  ;;  %v1921_v19 = vld [vmem:[%s2276_s6 + $0x10c] ss:$12 sps:$4 sm:$0xff]  }
  0x75   : > { %766 = vmatprep.subr.bf16.mxu0 %v1884_v21  ;;  %v1937_v21 = vld [vmem:[%s2276_s6 + $0x110] ss:$12 sps:$4 sm:$0xff]  }
  0x78   : > { %767 = vmatpush1.bf16.msra.mxu0 %v1882_v22  ;;  %v1924_v22 = vld [vmem:[%s2276_s6 + $0x124] ss:$12 sps:$4 sm:$0xff]  }
  0x79   : > { %768 = vmatprep.subr.bf16.mxu0 %v1888_v23  ;;  %v1922_v23 = vld [vmem:[%s2276_s6 + $0x120] ss:$12 sps:$4 sm:$0xff]  }
  0x7c   : > { %769 = vmatpush1.bf16.msra.mxu0 %v1886_v24  ;;  %v1938_v24 = vld [vmem:[%s2276_s6 + $0x128] ss:$12 sps:$4 sm:$0xff]  }
  0x7d   : > { %770 = vmatprep.subr.bf16.mxu0 %v1892_v44  ;;  %v1948_v44 = vld [vmem:[%s2270_s10 + $0xb0] sm:$0xff]  }
  0x80   : > { %771 = vmatpush1.bf16.msra.mxu0 %v1890_v45  ;;  %v1949_v45 = vld [vmem:[%s2270_s10 + $0xb8] sm:$0xff]  }
  0x81   : > { %772 = vmatprep.subr.bf16.mxu0 %v1896_v47  ;;  %v1951_v47 = vld [vmem:[%s2270_s10 + $0xc8] sm:$0xff]  }
  0x84   : > { %773 = vmatpush1.bf16.msra.mxu0 %v1894_v48 }
  0x85   : > { %774 = vmatprep.subr.bf16.mxu0 %v1900_v50 }
  0x88   : > { %775 = vmatpush1.bf16.msra.mxu0 %v1898_v51 }
  0x89   : > { %776 = vmatprep.subr.bf16.mxu0 %v1904_v53 }
  0x8c   : > { %777 = vmatpush1.bf16.msra.mxu0 %v1902_v54 }
  0x8d   : > { %778 = vmatprep.subr.bf16.mxu0 %v1908_v56  ;;  %v1090_v56 = vsub.s32 2, %v2333_v26 }
  0x90   : > { %779 = vmatpush1.bf16.msra.mxu0 %v1906_v57  ;;  %v1102_v57 = vsub.s32 3, %v2333_v26 }
  0x91   : > { %1006 = vmatprep.subr.bf16.mxu0 %v1912_v59 }
 0x146   : > { %v476_v30 = vpop.f32.mrb[0].mxu0 }
 0x147   : > { %v477_v31 = vadd.f32 %v476_v30, %v393_v29  ;;  %v1690_v32 = vpop.f32.mrb[1].mxu0  ;;  %v1939_v29 = vld [vmem:[%s2276_s6 + $0x140] ss:$12 sps:$4 sm:$0xff]  }
 0x148   : > { %v479_v33 = vpop.f32.mrb[2].mxu0  ;;  %v1930_v30 = vld [vmem:[%s2276_s6 + $0x154] ss:$12 sps:$4 sm:$0xff]   ;;  %v1940_v32 = vld [vmem:[%s2276_s6 + $0x158] ss:$12 sps:$4 sm:$0xff]  }
 0x149   : > { %v483_v34 = vmin.f32 %v477_v31, 0.0  ;;  %v1691_v35 = vpop.f32.mrb[3].mxu0  ;;  %vm482_vm1 = vcmp.gt.f32.partialorder %v477_v31, 0.0  ;;  %v1934_v33 = vld [vmem:[%s2276_s6 + $0x16c] ss:$12 sps:$4 sm:$0xff]  }
 0x14a   : > { %v2410_v35 = vld [vmem:[%s355_s26] sm:$0xff] }
 0x14b   : > { %v484_v36 = vmul.f32 1.442695, %v483_v34  ;;  %v1932_v34 = vld [vmem:[%s2276_s6 + $0x168] ss:$12 sps:$4 sm:$0xff]  }
 0x14d   : > { %1958 = vpow2.f32 %v484_v36  ;;  %v1941_v36 = vld [vmem:[%s2276_s6 + $0x170] ss:$12 sps:$4 sm:$0xff]  }
 0x157   : > { %v1959_v37 = vpop.eup %1958 }
 0x158   : > { %v1537_v38 = vadd.f32 -1.0, %v1959_v37  ;;  %v877_v37 = vpack.c.bf16 %v2410_v35, %v2410_v35 }
 0x15a   : > { %v487_v39 = vsel %vm482_vm1, %v477_v31, %v1537_v38  ;;  %v1928_v31 = vld [vmem:[%s2276_s6 + $0x150] ss:$12 sps:$4 sm:$0xff]   ;;  %v1942_v38 = vld [vmem:[%s2270_s10 + $0x80] sm:$0xff]  }
 0x15b   : > { %v504_v41 = vpack.c.bf16 %v487_v39, %v487_v39  ;;  %v1943_v39 = vld [vmem:[%s2270_s10 + $0x88] sm:$0xff]  }
 0x15d   : > { %1709 = vmatmul.mubr.bf16.vlgmr.msra.gmra.mrb[0].mxu1 %v504_v41  ;;  %v1945_v41 = vld [vmem:[%s2270_s10 + $0x98] sm:$0xff]  }
 0x15e   : > { %1713 = vmatpush3.bf16.msra.mxu1 %v1881_v40  ;;  %1728 = vmatprep.mubr.msk.bf16.mxu1 %vm2097_vm0, %v2096_v0  ;;  %v1944_v40 = vld [vmem:[%s2270_s10 + $0x90] sm:$0xff]  }
 0x15f   : > { %1714 = vmatprep.subr.bf16.mxu1 %v2096_v0 }
 0x162   : > { %1715 = vmatpush3.bf16.msra.mxu1 %v1885_v42  ;;  %v1946_v42 = vld [vmem:[%s2270_s10 + $0xa0] sm:$0xff]  }
 0x163   : > { %1716 = vmatprep.subr.bf16.mxu1 %v2096_v0 }
 0x166   : > { %1717 = vmatpush3.bf16.msra.mxu1 %v1889_v43  ;;  %v1947_v43 = vld [vmem:[%s2270_s10 + $0xa8] sm:$0xff]  }
 0x167   : > { %1718 = vmatprep.subr.bf16.mxu1 %v2096_v0 }
 0x16a   : > { %1719 = vmatpush3.bf16.msra.mxu1 %v1893_v46  ;;  %v1950_v46 = vld [vmem:[%s2270_s10 + $0xc0] sm:$0xff]  }
 0x16b   : > { %1720 = vmatprep.subr.bf16.mxu1 %v2096_v0 }
 0x16e   : > { %1721 = vmatpush3.bf16.msra.mxu1 %v1897_v49 }
 0x16f   : > { %1722 = vmatprep.subr.bf16.mxu1 %v2096_v0 }
 0x172   : > { %1723 = vmatpush3.bf16.msra.mxu1 %v1901_v52 }
 0x173   : > { %1724 = vmatprep.subr.bf16.mxu1 %v2096_v0 }
 0x176   : > { %1725 = vmatpush3.bf16.msra.mxu1 %v1905_v55 }
 0x177   : > { %1726 = vmatprep.subr.bf16.mxu1 %v2096_v0 }
 0x17a   : > { %1727 = vmatpush3.bf16.msra.mxu1 %v1909_v58  ;;  %v1091_v58 = vrot.slane %v2341_v28, %v1090_v56 }
 0x17b   : > { %1732 = vmatprep.subr.bf16.mxu1 %v2096_v0 }
 0x230   : > { %v591_v63 = vpop.f32.mrb[0].mxu1 }
 0x231   : > { %v592_v1 = vadd.f32 %v591_v63, %v508_v62  ;;  %v1710_v2 = vpop.f32.mrb[1].mxu1 }
 0x232   : > { %v594_v3 = vpop.f32.mrb[2].mxu1  ;;  %v1103_v2 = vrot.slane %v2341_v28, %v1102_v57 }
 0x233   : > { %v598_v4 = vmin.f32 %v592_v1, 0.0  ;;  %v1711_v5 = vpop.f32.mrb[3].mxu1  ;;  %vm597_vm2 = vcmp.gt.f32.partialorder %v592_v1, 0.0 }
 0x235   : > { %v599_v6 = vmul.f32 1.442695, %v598_v4 }
 0x237   : > { %1960 = vpow2.f32 %v599_v6 }
 0x241   : > { %v1961_v7 = vpop.eup %1960 }
 0x242   : > { %v1546_v8 = vadd.f32 -1.0, %v1961_v7 }
 0x244   : > { %v602_v9 = vsel %vm597_vm2, %v592_v1, %v1546_v8 }
 0x245   : > { %v635_v12 = vpack.c.bf16 %v602_v9, %v602_v9 }
 0x247   : > { %797 = vmatmul.mubr.bf16.vlgmr.msra.gmra.mrb[4].mxu0 %v635_v12  ;;  %1729 = vmatmul.mubr.bf16.vlgmr.msra.gmra.mrb[4].mxu1 %v635_v12 }
 0x248   : > { %1007 = vmatpush1.bf16.msra.mxu0 %v1910_v10  ;;  %1733 = vmatpush3.bf16.msra.mxu1 %v1931_v11 }
 0x249   : > { %1008 = vmatprep.subr.bf16.mxu0 %v1915_v13  ;;  %1734 = vmatprep.subr.bf16.mxu1 %v2096_v0  ;;  %v1118_v13 = vsub.s32 5, %v2333_v26 }
 0x24a   : > { %1038 = vmatprep.mubr.bf16.mxu0 %v2098_v60  ;;  %1748 = vmatprep.mubr.msk.bf16.mxu1 %vm2097_vm0, %v2096_v0 }
 0x24c   : > { %1009 = vmatpush1.bf16.msra.mxu0 %v1913_v14  ;;  %1735 = vmatpush3.bf16.msra.mxu1 %v1935_v15  ;;  %v1113_v14 = vsub.s32 4, %v2333_v26  ;;  %v1119_v15 = vrot.slane %v2341_v28, %v1118_v13 }
 0x24d   : > { %1010 = vmatprep.subr.bf16.mxu0 %v1918_v16  ;;  %1736 = vmatprep.subr.bf16.mxu1 %v2096_v0 }
 0x250   : > { %1011 = vmatpush1.bf16.msra.mxu0 %v1916_v17  ;;  %1737 = vmatpush3.bf16.msra.mxu1 %v1936_v18  ;;  %v1114_v17 = vrot.slane %v2341_v28, %v1113_v14 }
 0x251   : > { %1012 = vmatprep.subr.bf16.mxu0 %v1921_v19  ;;  %1738 = vmatprep.subr.bf16.mxu1 %v2096_v0 }
 0x254   : > { %1013 = vmatpush1.bf16.msra.mxu0 %v1919_v20  ;;  %1739 = vmatpush3.bf16.msra.mxu1 %v1937_v21 }
 0x255   : > { %1014 = vmatprep.subr.bf16.mxu0 %v1924_v22  ;;  %1740 = vmatprep.subr.bf16.mxu1 %v2096_v0 }
 0x258   : > { %1015 = vmatpush1.bf16.msra.mxu0 %v1922_v23  ;;  %1741 = vmatpush3.bf16.msra.mxu1 %v1938_v24 }
 0x259   : > { %1016 = vmatprep.subr.bf16.mxu0 %v1927_v25  ;;  %1742 = vmatprep.subr.bf16.mxu1 %v2096_v0 }
 0x25c   : > { %1017 = vmatpush1.bf16.msra.mxu0 %v1925_v27  ;;  %1743 = vmatpush3.bf16.msra.mxu1 %v1939_v29 }
 0x25d   : > { %1018 = vmatprep.subr.bf16.mxu0 %v1930_v30  ;;  %1744 = vmatprep.subr.bf16.mxu1 %v2096_v0 }
 0x260   : > { %1019 = vmatpush1.bf16.msra.mxu0 %v1928_v31  ;;  %1745 = vmatpush3.bf16.msra.mxu1 %v1940_v32 }
 0x261   : > { %1020 = vmatprep.subr.bf16.mxu0 %v1934_v33  ;;  %1746 = vmatprep.subr.bf16.mxu1 %v2096_v0  ;;  %v1952_v33 = vld [vmem:[%s2270_s10 + $0xd0] sm:$0xff]  }
 0x264   : > { %1021 = vmatpush1.bf16.msra.mxu0 %v1932_v34  ;;  %1747 = vmatpush3.bf16.msra.mxu1 %v1941_v36  ;;  %v1953_v34 = vld [vmem:[%s2270_s10 + $0xd8] sm:$0xff]   ;;  %v1955_v36 = vld [vmem:[%s2270_s10 + $0xe8] sm:$0xff]  }
 0x265   : > { %1752 = vmatprep.subr.bf16.mxu0 %v2096_v0  ;;  %1772 = vmatprep.subr.bf16.mxu1 %v2096_v0 }
 0x267   : > { %1039 = vmatmul.mubr.bf16.vlgmr.msra.gmra.mrb[8].mxu0 %v877_v37  ;;  %1749 = vmatmul.mubr.bf16.vlgmr.msra.gmra.mrb[8].mxu1 %v877_v37  ;;  %v1956_v37 = vld [vmem:[%s2270_s10 + $0xf0] sm:$0xff]  }
 0x268   : > { %1768 = vmatprep.mubr.msk.bf16.mxu0 %vm2097_vm0, %v2096_v0  ;;  %1788 = vmatprep.mubr.msk.bf16.mxu1 %vm2097_vm0, %v2096_v0 }
 0x269   : > { %1753 = vmatpush3.bf16.msra.mxu0 %v1942_v38  ;;  %1773 = vmatpush3.bf16.msra.mxu1 %v1950_v46  ;;  %v1957_v38 = vld [vmem:[%s2270_s10 + $0xf8] sm:$0xff]  }
 0x26a   : > { %1754 = vmatprep.subr.bf16.mxu0 %v2096_v0  ;;  %1774 = vmatprep.subr.bf16.mxu1 %v2096_v0 }
 0x26d   : > { %1755 = vmatpush3.bf16.msra.mxu0 %v1943_v39  ;;  %1775 = vmatpush3.bf16.msra.mxu1 %v1951_v47  ;;  %v1147_v39 = vsub.s32 6, %v2333_v26 }
 0x26e   : > { %1756 = vmatprep.subr.bf16.mxu0 %v2096_v0  ;;  %1776 = vmatprep.subr.bf16.mxu1 %v2096_v0 }
 0x271   : > { %1757 = vmatpush3.bf16.msra.mxu0 %v1944_v40  ;;  %1777 = vmatpush3.bf16.msra.mxu1 %v1952_v33  ;;  %v1148_v40 = vrot.slane %v2341_v28, %v1147_v39 }
 0x272   : > { %1758 = vmatprep.subr.bf16.mxu0 %v2096_v0  ;;  %1778 = vmatprep.subr.bf16.mxu1 %v2096_v0 }
 0x275   : > { %1759 = vmatpush3.bf16.msra.mxu0 %v1945_v41  ;;  %1779 = vmatpush3.bf16.msra.mxu1 %v1953_v34 }
 0x276   : > { %1760 = vmatprep.subr.bf16.mxu0 %v2096_v0  ;;  %1780 = vmatprep.subr.bf16.mxu1 %v2096_v0 }
 0x279   : > { %1761 = vmatpush3.bf16.msra.mxu0 %v1946_v42 }
 0x27a   : > { %1762 = vmatprep.subr.bf16.mxu0 %v2096_v0 }
 0x27d   : > { %1763 = vmatpush3.bf16.msra.mxu0 %v1947_v43 }
 0x27e   : > { %1764 = vmatprep.subr.bf16.mxu0 %v2096_v0 }
 0x281   : > { %1765 = vmatpush3.bf16.msra.mxu0 %v1948_v44 }
 0x282   : > { %1766 = vmatprep.subr.bf16.mxu0 %v2096_v0 }
 0x285   : > { %1767 = vmatpush3.bf16.msra.mxu0 %v1949_v45 }
 0x31a   : > { %v798_v48 = vpop.f32.mrb[4].mxu0  ;;  %v839_v49 = vpop.f32.mrb[4].mxu1 }
 0x31b   : > { %v800_v50 = vpop.f32.mrb[5].mxu0  ;;  %v1730_v51 = vpop.f32.mrb[5].mxu1  ;;  %v1115_v21 = vadd.f32 %v1114_v17, %v839_v49 }
 0x31c   : > { %v802_v52 = vpop.f32.mrb[6].mxu0  ;;  %v842_v53 = vpop.f32.mrb[6].mxu1  ;;  %v1262_v51 = vsub.s32 7, %v2333_v26 }
 0x31d   : > { %v803_v54 = vpop.f32.mrb[7].mxu0  ;;  %v1731_v55 = vpop.f32.mrb[7].mxu1 }
 0x31e   : > { %v1263_v52 = vrot.slane %v2341_v28, %v1262_v51 }
 0x33a   : > { %v1040_v59 = vpop.f32.mrb[8].mxu0  ;;  %v1081_v60 = vpop.f32.mrb[8].mxu1 }
 0x33b   : > { %v1087_v61 = vadd.f32 %v1040_v59, %v798_v48  ;;  %v1042_v62 = vpop.f32.mrb[9].mxu0  ;;  %v1750_v63 = vpop.f32.mrb[9].mxu1  ;;  %v1120_v19 = vadd.f32 %v1119_v15, %v1081_v60 }
 0x33c   : > { %v1099_v1 = vadd.f32 %v1042_v62, %v800_v50  ;;  %v1044_v3 = vpop.f32.mrb[10].mxu0  ;;  %v1084_v4 = vpop.f32.mrb[10].mxu1 }
 0x33d   : > { %v1092_v5 = vadd.f32 %v1091_v58, %v1087_v61  ;;  %v1045_v6 = vpop.f32.mrb[11].mxu0  ;;  %v1751_v7 = vpop.f32.mrb[11].mxu1 }
 0x33e   : > { %v1104_v9 = vadd.f32 %v1103_v2, %v1099_v1 }
 0x33f   : > { %v1595_v8 = vmul.f32 -1.442695, %v1092_v5 }
 0x340   : > { %v1596_v10 = vmul.f32 -1.442695, %v1104_v9 }
 0x341   : > { %1962 = vpow2.f32 %v1595_v8 }
 0x342   : > { %1964 = vpow2.f32 %v1596_v10 }
 0x34b   : > { %v1963_v11 = vpop.eup %1962 }
 0x34c   : > { %v1096_v12 = vadd.f32 1.0, %v1963_v11  ;;  %v1965_v16 = vpop.eup %1964 }
 0x34d   : > { %v1108_v18 = vadd.f32 1.0, %v1965_v16 }
 0x34e   : > { %1966 = vrcp.f32 %v1096_v12 }
 0x34f   : > { %1968 = vrcp.f32 %v1108_v18 }
 0x358   : > { %v1967_v20 = vpop.eup %1966 }
 0x359   : > { %v1121_v22 = vmul.f32 %v1967_v20, %v1120_v19  ;;  %v1969_v24 = vpop.eup %1968 }
 0x35a   : > { %v1124_v25 = vsub.f32 1.0, %v1969_v24  ;;  %v1126_v30 = vmul.f32 %v1969_v24, %v2410_v35  ;;  %v1954_v35 = vld [vmem:[%s2270_s10 + $0xe0] sm:$0xff]  }
 0x35b   : > { %v1122_v23 = vadd.f32 %v1121_v22, %v1115_v21  ;;  %1781 = vmatpush3.bf16.msra.mxu1 %v1954_v35 }
 0x35c   : > { %1782 = vmatprep.subr.bf16.mxu1 %v2096_v0 }
 0x35d   : > { %1970 = vtanh.f32 %v1122_v23 }
 0x35f   : > { %1783 = vmatpush3.bf16.msra.mxu1 %v1955_v36 }
 0x360   : > { %1784 = vmatprep.subr.bf16.mxu1 %v2096_v0 }
 0x363   : > { %1785 = vmatpush3.bf16.msra.mxu1 %v1956_v37 }
 0x364   : > { %1786 = vmatprep.subr.bf16.mxu1 %v2096_v0 }
 0x367   : > { %v1971_v27 = vpop.eup %1970  ;;  %1787 = vmatpush3.bf16.msra.mxu1 %v1957_v38 }
 0x368   : > { %v1125_v29 = vmul.f32 %v1971_v27, %v1124_v25 }
 0x36a   : > { %v1127_v31 = vadd.f32 %v1126_v30, %v1125_v29 }
 0x36c   : > { %v1144_v32 = vpack.c.bf16 %v1127_v31, %v1127_v31  ;;  %1353 = vst [vmem:[%s2454_s8 + $0x8] sm:$0xff] %v1127_v31 }
 0x36e   : > { %1769 = vmatmul.mubr.bf16.vlgmr.msra.gmra.mrb[12].mxu0 %v1144_v32 }
 0x441   : > { %v1231_v41 = vpop.f32.mrb[12].mxu0 }
 0x442   : > { %v1232_v42 = vadd.f32 %v1231_v41, %v1148_v40  ;;  %v1770_v43 = vpop.f32.mrb[13].mxu0 }
 0x443   : > { %v1234_v44 = vpop.f32.mrb[14].mxu0 }
 0x444   : > { %v1238_v45 = vmin.f32 %v1232_v42, 0.0  ;;  %v1771_v46 = vpop.f32.mrb[15].mxu0  ;;  %vm1237_vm3 = vcmp.gt.f32.partialorder %v1232_v42, 0.0 }
 0x446   : > { %v1239_v47 = vmul.f32 1.442695, %v1238_v45 }
 0x448   : > { %1972 = vpow2.f32 %v1239_v47 }
 0x452   : > { %v1973_v48 = vpop.eup %1972 }
 0x453   : > { %v1605_v49 = vadd.f32 -1.0, %v1973_v48 }
 0x455   : > { %v1242_v50 = vsel %vm1237_vm3, %v1232_v42, %v1605_v49 }
 0x456   : > { %v1259_v0 = vpack.c.bf16 %v1242_v50, %v1242_v50 }
 0x458   : > { %1789 = vmatmul.mubr.bf16.vlgmr.msra.gmra.mrb[12].mxu1 %v1259_v0 }
 0x52b   : > { %v1346_v53 = vpop.f32.mrb[12].mxu1 }
 0x52c   : > { %v1347_v54 = vadd.f32 %v1346_v53, %v1263_v52  ;;  %v1790_v55 = vpop.f32.mrb[13].mxu1 }
 0x52d   : > { %v1349_v56 = vpop.f32.mrb[14].mxu1 }
 0x52e   : > { %1352 = vst [vmem:[%s2454_s8] sm:$0xff] %v1347_v54  ;;  %v1791_v57 = vpop.f32.mrb[15].mxu1 }
 0x52f PF: > { %s21_s23 = sadd.s32 1, %s2088_s23   ;;  %s2503_s18 = smov %s2072_s19 }
 0x530   : > { %p18_p11 = scmp.ge.s32.totalorder %s21_s23, 4   ;;  %s2504_s19 = smov %s2076_s20 }
 0x531   : > { %s2505_s20 = smov %s2178_s30  ;;  %s2506_s21 = smov %s2084_s22 }
 0x532   : > { %s2507_s22 = smov %s2509_s25  ;;  %20 = sbr.rel (!%p18_p11) target bundleno = 6 (0x6), region = 102 }
 0x539   :  { %1383 = vsyncpa [#allocation3], 1 }
 0x53a   :  { %1385 = vsyncpa [#allocation3 + $0x1], 1 }
 0x53b   :  { %1386 = vsyncpa [#allocation5], 1 }
 0x53c   :  { %1388 = vsyncpa [#allocation5 + $0x1], 1 }

</bundles_post_ra>
